<compile_context>
chip_gen: v7x
topology: tpu7x:2x2x1
jax: 0.10.0
libtpu: 0.0.40
codegen_flags: <defaults>
</compile_context>

<pallas_src>
import functools

import jax
import jax.numpy as jnp
from jax.experimental import pallas as pl
from jax.experimental.pallas import tpu as pltpu

_NEG_LARGE = -1e30  # plain Python float: masks padded logits; exp -> 0.


def _mlp_kernel(x_ref, w1_ref, b1_ref, w2_ref, b2_ref, out_ref, *, dim_out):
    """Fused: linear1 + bias + ReLU + linear2 + bias + masked row-softmax.

    Ref shapes (per batch tile TB):
        x_ref  : (TB, Din)       flattened input tile
        w1_ref : (Din, Dh)       first linear weight (already transposed)
        b1_ref : (1, Dh)         first linear bias
        w2_ref : (Dh, Dpad)      second linear weight, lane-padded to Dpad
        b2_ref : (1, Dpad)       second linear bias, lane-padded
        out_ref: (TB, Dpad)      lane-dense softmax output (padded cols == 0)
    """
    # (TB, Din) @ (Din, Dh): single MXU matmul, f32 accumulate.
    h = jnp.dot(x_ref[...], w1_ref[...], preferred_element_type=jnp.float32)
    h = h + b1_ref[...]
    # Dropout (eval mode) == identity.
    h = jnp.maximum(h, 0.0)                                   # ReLU

    # (TB, Dh) @ (Dh, Dpad): second MXU matmul into the lane-padded slab.
    logits = jnp.dot(h, w2_ref[...], preferred_element_type=jnp.float32)
    logits = logits + b2_ref[...]

    # Mask the padded columns so softmax matches a softmax over dim_out cols.
    col = jax.lax.broadcasted_iota(jnp.int32, logits.shape, dimension=1)
    logits = jnp.where(col < dim_out, logits, _NEG_LARGE)

    # Numerically stable row softmax (dim=1).
    m = jnp.max(logits, axis=1, keepdims=True)
    e = jnp.exp(logits - m)
    denom = jnp.sum(e, axis=1, keepdims=True)
    out_ref[...] = e * pl.reciprocal(denom, approx=False)


def mlp_forward(x, params, *, batch_tile=128):
    """MLP.forward.  x: (N, C, H, W) float32; params in PyTorch layout."""
    n = x.shape[0]
    dim_in = x.shape[1] * x.shape[-2] * x.shape[-1]
    xf = x.reshape(n, dim_in).astype(jnp.float32)

    # torch Linear stores weight as (out_features, in_features); transpose.
    w1 = jnp.transpose(params["w1"]).astype(jnp.float32)      # (Din, Dh)
    b1 = params["b1"].reshape(1, -1).astype(jnp.float32)      # (1, Dh)
    w2 = jnp.transpose(params["w2"]).astype(jnp.float32)      # (Dh, Dout)
    b2 = params["b2"].reshape(1, -1).astype(jnp.float32)      # (1, Dout)

    dim_hidden = w1.shape[1]
    dim_out = w2.shape[1]

    # Zero-pad the output dim to a lane-dense multiple of 128.
    dpad = 128 * pl.cdiv(dim_out, 128)
    w2p = jnp.zeros((dim_hidden, dpad), jnp.float32).at[:, :dim_out].set(w2)
    b2p = jnp.zeros((1, dpad), jnp.float32).at[:, :dim_out].set(b2)

    tb = min(batch_tile, n)
    assert n % tb == 0, "batch must be divisible by the batch tile"

    kernel = functools.partial(_mlp_kernel, dim_out=dim_out)

    out_pad = pl.pallas_call(
        kernel,
        out_shape=jax.ShapeDtypeStruct((n, dpad), jnp.float32),
        grid_spec=pltpu.PrefetchScalarGridSpec(
            num_scalar_prefetch=0,
            grid=(n // tb,),
            in_specs=[
                pl.BlockSpec((tb, dim_in), lambda i: (i, 0)),
                pl.BlockSpec((dim_in, dim_hidden), lambda i: (0, 0)),
                pl.BlockSpec((1, dim_hidden), lambda i: (0, 0)),
                pl.BlockSpec((dim_hidden, dpad), lambda i: (0, 0)),
                pl.BlockSpec((1, dpad), lambda i: (0, 0)),
            ],
            out_specs=pl.BlockSpec((tb, dpad), lambda i: (i, 0)),
        ),
        compiler_params=pltpu.CompilerParams(
            dimension_semantics=("parallel",)),
    )(xf, w1, b1, w2p, b2p)

    # Slice the real classes back out (cheap XLA slice in the wrapper).
    return out_pad[:, :dim_out]


# ----------------------------- reference (pure JAX) --------------------------
def mlp_reference(x, params):
    n = x.shape[0]
    xf = x.reshape(n, x.shape[1] * x.shape[-2] * x.shape[-1])
    h = xf @ params["w1"].T + params["b1"]
    h = jnp.maximum(h, 0.0)                   # dropout (eval) is identity
    logits = h @ params["w2"].T + params["b2"]
    return jax.nn.softmax(logits, axis=1)


# ---------------------------------- main -------------------------------------
if __name__ == "__main__":
    key = jax.random.PRNGKey(0)
    N, C, H, W = 16, 4, 16, 16                 # dim_in = C*H*W = 1024
    DIM_IN, DIM_HIDDEN, DIM_OUT = C * H * W, 256, 10

    k_x, k_w1, k_b1, k_w2, k_b2 = jax.random.split(key, 5)

    x = jax.random.normal(k_x, (N, C, H, W), dtype=jnp.float32)
    params = {
        # PyTorch Linear layout: weight (out_features, in_features)
        "w1": 0.05 * jax.random.normal(k_w1, (DIM_HIDDEN, DIM_IN), jnp.float32),
        "b1": 0.05 * jax.random.normal(k_b1, (DIM_HIDDEN,), jnp.float32),
        "w2": 0.05 * jax.random.normal(k_w2, (DIM_OUT, DIM_HIDDEN), jnp.float32),
        "b2": 0.05 * jax.random.normal(k_b2, (DIM_OUT,), jnp.float32),
    }

    out = jax.block_until_ready(mlp_forward(x, params))
    ref = jax.block_until_ready(mlp_reference(x, params))

    assert out.shape == (N, DIM_OUT), out.shape
    # rows sum to 1 (softmax sanity)
    assert jnp.allclose(jnp.sum(out, axis=1), 1.0, atol=1e-5)
    assert jnp.allclose(out, ref, atol=1e-4, rtol=1e-4), float(
        jnp.max(jnp.abs(out - ref)))

    print("KERNEL_OK")
</pallas_src>

<mosaic_0001>
module attributes {stable_mosaic.version = 11 : i64} {
  func.func @_mlp_kernel(%arg0: i32, %arg1: memref<16x1024xf32, #tpu.memory_space<vmem>>, %arg2: memref<1024x256xf32, #tpu.memory_space<vmem>>, %arg3: memref<1x256xf32, #tpu.memory_space<vmem>>, %arg4: memref<256x128xf32, #tpu.memory_space<vmem>>, %arg5: memref<1x128xf32, #tpu.memory_space<vmem>>, %arg6: memref<16x128xf32, #tpu.memory_space<vmem>>) attributes {dimension_semantics = [#tpu.dimension_semantics<parallel>], iteration_bounds = array<i64: 1>, scalar_prefetch = 0 : i64, scratch_operands = 0 : i64, tpu.core_type = #tpu.core_type<tc>, window_params = [{transform_indices = @transform_0, window_bounds = array<i64: 16, 1024>}, {pipeline_mode = #tpu.pipeline_mode<synchronous>, transform_indices = @transform_1, window_bounds = array<i64: 1024, 256>}, {pipeline_mode = #tpu.pipeline_mode<synchronous>, transform_indices = @transform_2, window_bounds = array<i64: 1, 256>}, {pipeline_mode = #tpu.pipeline_mode<synchronous>, transform_indices = @transform_3, window_bounds = array<i64: 256, 128>}, {pipeline_mode = #tpu.pipeline_mode<synchronous>, transform_indices = @transform_4, window_bounds = array<i64: 1, 128>}, {transform_indices = @transform_5, window_bounds = array<i64: 16, 128>}]} {
    %c0 = arith.constant 0 : index
    %c0_0 = arith.constant 0 : index
    %0 = vector.load %arg1[%c0, %c0_0] : memref<16x1024xf32, #tpu.memory_space<vmem>>, vector<16x1024xf32>
    %c0_1 = arith.constant 0 : index
    %c0_2 = arith.constant 0 : index
    %1 = vector.load %arg2[%c0_1, %c0_2] : memref<1024x256xf32, #tpu.memory_space<vmem>>, vector<1024x256xf32>
    %cst = arith.constant dense<0.000000e+00> : vector<16x256xf32>
    %2 = tpu.matmul %0, %1, %cst {dimension_numbers = #tpu.dot_dimension_numbers<[1], [0], [0], [1], [0, 0, 1, 1], [], []>} : vector<16x1024xf32>, vector<1024x256xf32>, vector<16x256xf32> -> vector<16x256xf32>
    %c0_3 = arith.constant 0 : index
    %c0_4 = arith.constant 0 : index
    %3 = vector.load %arg3[%c0_3, %c0_4] : memref<1x256xf32, #tpu.memory_space<vmem>>, vector<1x256xf32>
    %4 = vector.broadcast %3 : vector<1x256xf32> to vector<16x256xf32>
    %5 = arith.addf %2, %4 : vector<16x256xf32>
    %cst_5 = arith.constant 0.000000e+00 : f32
    %6 = vector.broadcast %cst_5 : f32 to vector<16x256xf32>
    %7 = arith.maximumf %5, %6 : vector<16x256xf32>
    %c0_6 = arith.constant 0 : index
    %c0_7 = arith.constant 0 : index
    %8 = vector.load %arg4[%c0_6, %c0_7] : memref<256x128xf32, #tpu.memory_space<vmem>>, vector<256x128xf32>
    %cst_8 = arith.constant dense<0.000000e+00> : vector<16x128xf32>
    %9 = tpu.matmul %7, %8, %cst_8 {dimension_numbers = #tpu.dot_dimension_numbers<[1], [0], [0], [1], [0, 0, 1, 1], [], []>} : vector<16x256xf32>, vector<256x128xf32>, vector<16x128xf32> -> vector<16x128xf32>
    %c0_9 = arith.constant 0 : index
    %c0_10 = arith.constant 0 : index
    %10 = vector.load %arg5[%c0_9, %c0_10] : memref<1x128xf32, #tpu.memory_space<vmem>>, vector<1x128xf32>
    %11 = vector.broadcast %10 : vector<1x128xf32> to vector<16x128xf32>
    %12 = arith.addf %9, %11 : vector<16x128xf32>
    %13 = tpu.iota {dimensions = array<i32: 1>} : vector<16x128xi32>
    %c10_i32 = arith.constant 10 : i32
    %14 = vector.broadcast %c10_i32 : i32 to vector<16x128xi32>
    %15 = arith.cmpi slt, %13, %14 : vector<16x128xi32>
    %cst_11 = arith.constant -1.000000e+30 : f32
    %16 = vector.broadcast %cst_11 : f32 to vector<16x128xf32>
    %17 = arith.select %15, %12, %16 : vector<16x128xi1>, vector<16x128xf32>
    %cst_12 = arith.constant dense<0xFF800000> : vector<16xf32>
    %18 = vector.multi_reduction <maximumf>, %17, %cst_12 [1] : vector<16x128xf32> to vector<16xf32>
    %19 = vector.shape_cast %18 : vector<16xf32> to vector<16x1xf32>
    %20 = vector.broadcast %19 : vector<16x1xf32> to vector<16x128xf32>
    %21 = arith.subf %17, %20 : vector<16x128xf32>
    %22 = math.exp %21 : vector<16x128xf32>
    %cst_13 = arith.constant dense<0.000000e+00> : vector<16xf32>
    %23 = vector.multi_reduction <add>, %22, %cst_13 [1] : vector<16x128xf32> to vector<16xf32>
    %24 = vector.shape_cast %23 : vector<16xf32> to vector<16x1xf32>
    %25 = tpu.reciprocal %24 : vector<16x1xf32> -> vector<16x1xf32>
    %26 = vector.broadcast %25 : vector<16x1xf32> to vector<16x128xf32>
    %27 = arith.mulf %22, %26 : vector<16x128xf32>
    %c0_14 = arith.constant 0 : index
    %c0_15 = arith.constant 0 : index
    %28 = vector.load %arg6[%c0_14, %c0_15] : memref<16x128xf32, #tpu.memory_space<vmem>>, vector<16x128xf32>
    tpu.vector_store %arg6[%c0_14, %c0_15], %27 {strides = array<i32>} : memref<16x128xf32, #tpu.memory_space<vmem>>, vector<16x128xf32>,
    return
  }
  func.func @transform_0(%arg0: i32) -> (i32, i32) {
    %c0_i32 = arith.constant 0 : i32
    %c0_i32_0 = arith.constant 0 : i32
    return %arg0, %c0_i32 : i32, i32
  }
  func.func @transform_1(%arg0: i32) -> (i32, i32) {
    %c0_i32 = arith.constant 0 : i32
    %c0_i32_0 = arith.constant 0 : i32
    %c0_i32_1 = arith.constant 0 : i32
    return %c0_i32, %c0_i32_0 : i32, i32
  }
  func.func @transform_2(%arg0: i32) -> (i32, i32) {
    %c0_i32 = arith.constant 0 : i32
    %c0_i32_0 = arith.constant 0 : i32
    %c0_i32_1 = arith.constant 0 : i32
    return %c0_i32, %c0_i32_0 : i32, i32
  }
  func.func @transform_3(%arg0: i32) -> (i32, i32) {
    %c0_i32 = arith.constant 0 : i32
    %c0_i32_0 = arith.constant 0 : i32
    %c0_i32_1 = arith.constant 0 : i32
    return %c0_i32, %c0_i32_0 : i32, i32
  }
  func.func @transform_4(%arg0: i32) -> (i32, i32) {
    %c0_i32 = arith.constant 0 : i32
    %c0_i32_0 = arith.constant 0 : i32
    %c0_i32_1 = arith.constant 0 : i32
    return %c0_i32, %c0_i32_0 : i32, i32
  }
  func.func @transform_5(%arg0: i32) -> (i32, i32) {
    %c0_i32 = arith.constant 0 : i32
    %c0_i32_0 = arith.constant 0 : i32
    return %arg0, %c0_i32 : i32, i32
  }
}

</mosaic_0001>

<bundles_post_ra>
// kernel: tpu_custom_call.1
= control target key start
LH: loop header
LB: loop body
LE: loop exit
PB: predicated region body
PF: predicated region fallthrough
CT: control target
= control target key end

     0   :  { %10 = vsyncpa [#allocation3], 0  ;;  %s1386_s0 = inlined_call_operand.hbm [shape: f32[16,1024], index: 0, kind: input, shape index: {}]   ;;  %s1387_s1 = inlined_call_operand.hbm [shape: f32[1024,256], index: 1, kind: input, shape index: {}]   ;;  %s1388_s2 = inlined_call_operand.vmem [shape: f32[1,256], index: 2, kind: input, shape index: {}]   ;;  %s1389_s3 = inlined_call_operand.hbm [shape: f32[256,128], index: 3, kind: input, shape index: {}]   ;;  %s1390_s4 = inlined_call_operand.vmem [shape: f32[1,128], index: 4, kind: input, shape index: {}]   ;;  %s1391_s5 = inlined_call_operand.hbm [shape: f32[16,128], index: 5, kind: output, shape index: {}]  }
   0x1   :  { %11 = vsyncpa [#allocation6], 0 }
   0x2   :  { %12 = vsyncpa [#allocation4], 0  ;;  %s1286_s18 = smov [#allocation5]   ;;  %s1192_s22 = scalar_lea.hbm %s1387_s1, 32768 }
   0x3   :  { %s30_s19 = sshll.u32 %s1286_s18, 4  ;;  %p1193_p0 = scmp.ne.s32.totalorder %s1387_s1, %s1192_s22  ;;  %s31_s19 = int_to_ptr.vmem [resolvable:$true] %s30_s19 }
   0x4   :  { %p1196_p1 = scmp.lt.u32.totalorder %s1192_s22, %s1387_s1 }
   0x6   :  { %p1198_p2 = pnand %p1196_p1, %p1193_p0 }
   0x8   :  { %1201 = shalt.err (!%p1198_p2)
}
   0x9   :  { %s1202_s27 = scalar_lea.vmem %s31_s19, 32768  ;;  %p1207_p4 = scmp.lt.s32.totalorder %s31_s19, %s31_s19 }
   0xa   :  { %p1203_p3 = scmp.ne.s32.totalorder %s31_s19, %s1202_s27  ;;  %p1208_p5 = scmp.lt.s32.totalorder %s1202_s27, %s1202_s27 }
   0xc   :  { %p1209_p6 = por %p1208_p5, %p1207_p4 }
   0xe   :  { %p1210_p7 = pnand %p1209_p6, %p1203_p3 }
  0x10   :  { %1213 = shalt.err (!%p1210_p7)
}
  0x11   :  { %s1287_s28 = smov 256   ;;  %s1288_s29 = smov 16  }
  0x12   :  { %36 = dma.hbm_to_vmem [thread:$0]  %s1387_s1, 32768, %s31_s19, [#allocation6], %s1287_s28, %s1287_s28, %s1288_s29  }
  0x13   :  { %s1289_s7 = smov [#allocation2]   ;;  %s1214_s11 = scalar_lea.hbm %s1386_s0, 2048 }
  0x14   :  { %s18_s8 = sshll.u32 %s1289_s7, 4  ;;  %p1215_p8 = scmp.ne.s32.totalorder %s1386_s0, %s1214_s11  ;;  %s19_s8 = int_to_ptr.vmem [resolvable:$true] %s18_s8 }
  0x15   :  { %p1218_p9 = scmp.lt.u32.totalorder %s1214_s11, %s1386_s0 }
  0x17   :  { %p1220_p10 = pnand %p1218_p9, %p1215_p8 }
  0x19   :  { %1223 = shalt.err (!%p1220_p10)
}
  0x1a   :  { %s1224_s16 = scalar_lea.vmem %s19_s8, 2048  ;;  %p1229_p12 = scmp.lt.s32.totalorder %s19_s8, %s19_s8 }
  0x1b   :  { %p1225_p11 = scmp.ne.s32.totalorder %s19_s8, %s1224_s16  ;;  %p1230_p13 = scmp.lt.s32.totalorder %s1224_s16, %s1224_s16 }
  0x1d   :  { %p1231_p0 = por %p1230_p13, %p1229_p12 }
  0x1f   :  { %p1232_p1 = pnand %p1231_p0, %p1225_p11 }
  0x21   :  { %1235 = shalt.err (!%p1232_p1)
}
  0x22   :  { %s1290_s1 = smov 1024   ;;  %s1291_s17 = smov 64  }
  0x23   :  { %24 = dma.hbm_to_vmem [thread:$0]  %s1386_s0, 2048, %s19_s8, [#allocation3], %s1290_s1, %s1290_s1, %s1291_s17  }
  0x24   :  { %s1292_s20 = smov [#allocation7]   ;;  %s1236_s24 = scalar_lea.hbm %s1389_s3, 4096 }
  0x25   :  { %s44_s21 = sshll.u32 %s1292_s20, 4  ;;  %p1237_p2 = scmp.ne.s32.totalorder %s1389_s3, %s1236_s24  ;;  %s45_s21 = int_to_ptr.vmem [resolvable:$true] %s44_s21 }
  0x26   :  { %p1240_p3 = scmp.lt.u32.totalorder %s1236_s24, %s1389_s3 }
  0x28   :  { %p1242_p4 = pnand %p1240_p3, %p1237_p2 }
  0x2a   :  { %1245 = shalt.err (!%p1242_p4)
}
  0x2b   :  { %s1246_s29 = scalar_lea.vmem %s45_s21, 4096  ;;  %p1251_p6 = scmp.lt.s32.totalorder %s45_s21, %s45_s21 }
  0x2c   :  { %p1247_p5 = scmp.ne.s32.totalorder %s45_s21, %s1246_s29  ;;  %p1252_p7 = scmp.lt.s32.totalorder %s1246_s29, %s1246_s29 }
  0x2e   :  { %p1253_p8 = por %p1252_p7, %p1251_p6 }
  0x30   :  { %p1254_p9 = pnand %p1253_p8, %p1247_p5 }
  0x32   :  { %1257 = shalt.err (!%p1254_p9)
}
  0x33   :  { %s1293_s0 = smov 128   ;;  %s1294_s30 = smov 8  }
  0x34   :  { %50 = dma.hbm_to_vmem [thread:$0]  %s1389_s3, 4096, %s45_s21, [#allocation6], %s1293_s0, %s1293_s0, %s1294_s30  }
  0x35   :  { %1280 = dma.done.wait [#allocation3], 2048  }
  0x36   :  { %1281 = vsyncadd [#allocation3], 4294965248 }
  0x37   :  { %1282 = dma.done.wait [#allocation6], 36864  }
  0x38   :  { %1283 = vsyncadd [#allocation6], 4294930432  ;;  %v79_v0 = vld [vmem:[#allocation5 + $0x8] sm:$0xff]  ;;  %v81_v1 = vld [vmem:[#allocation5 + $0x18] sm:$0xff] }
  0x39   :  { %v207_v2 = vld [vmem:[#allocation5 + $0x408] sm:$0xff]  ;;  %v854_v3 = vpack.c.bf16 %v81_v1, %v79_v0  ;;  %v209_v4 = vld [vmem:[#allocation5 + $0x418] sm:$0xff]  ;;  %v78_v5 = vld [vmem:[#allocation5] sm:$0xff] }
  0x3a   :  { %v80_v6 = vld [vmem:[#allocation5 + $0x10] sm:$0xff]  ;;  %v982_v7 = vpack.c.bf16 %v209_v4, %v207_v2  ;;  %v206_v9 = vld [vmem:[#allocation5 + $0x400] sm:$0xff]  ;;  %v83_v11 = vld [vmem:[#allocation5 + $0x28] sm:$0xff] }
  0x3b   :  { %v856_v8 = vpack.c.bf16 %v80_v6, %v78_v5  ;;  %v208_v10 = vld [vmem:[#allocation5 + $0x410] sm:$0xff]  ;;  %855 = vmatprep.subr.bf16.mxu1 %v854_v3  ;;  %v85_v13 = vld [vmem:[#allocation5 + $0x38] sm:$0xff]  ;;  %v211_v14 = vld [vmem:[#allocation5 + $0x428] sm:$0xff] }
  0x3c   :  { %v984_v12 = vpack.c.bf16 %v208_v10, %v206_v9  ;;  %v213_v15 = vld [vmem:[#allocation5 + $0x438] sm:$0xff]  ;;  %983 = vmatprep.subr.bf16.mxu0 %v982_v7  ;;  %v858_v16 = vpack.c.bf16 %v85_v13, %v83_v11  ;;  %v82_v18 = vld [vmem:[#allocation5 + $0x20] sm:$0xff]  ;;  %v84_v19 = vld [vmem:[#allocation5 + $0x30] sm:$0xff] }
  0x3d   :  { %857 = vmatpush1.bf16.msra.mxu1 %v856_v8  ;;  %v986_v17 = vpack.c.bf16 %v213_v15, %v211_v14  ;;  %v210_v20 = vld [vmem:[#allocation5 + $0x420] sm:$0xff]  ;;  %v860_v21 = vpack.c.bf16 %v84_v19, %v82_v18  ;;  %v212_v22 = vld [vmem:[#allocation5 + $0x430] sm:$0xff]  ;;  %v87_v23 = vld [vmem:[#allocation5 + $0x48] sm:$0xff] }
  0x3e   :  { %985 = vmatpush1.bf16.msra.mxu0 %v984_v12  ;;  %v89_v24 = vld [vmem:[#allocation5 + $0x58] sm:$0xff]  ;;  %859 = vmatprep.subr.bf16.mxu1 %v858_v16  ;;  %v988_v25 = vpack.c.bf16 %v212_v22, %v210_v20  ;;  %v215_v27 = vld [vmem:[#allocation5 + $0x448] sm:$0xff]  ;;  %v86_v29 = vld [vmem:[#allocation5 + $0x40] sm:$0xff] }
  0x3f   :  { %987 = vmatprep.subr.bf16.mxu0 %v986_v17  ;;  %v862_v26 = vpack.c.bf16 %v89_v24, %v87_v23  ;;  %v217_v28 = vld [vmem:[#allocation5 + $0x458] sm:$0xff]  ;;  %v88_v31 = vld [vmem:[#allocation5 + $0x50] sm:$0xff]  ;;  %v214_v32 = vld [vmem:[#allocation5 + $0x440] sm:$0xff] }
  0x40   :  { %v990_v30 = vpack.c.bf16 %v217_v28, %v215_v27  ;;  %v216_v33 = vld [vmem:[#allocation5 + $0x450] sm:$0xff]  ;;  %v864_v34 = vpack.c.bf16 %v88_v31, %v86_v29  ;;  %v91_v35 = vld [vmem:[#allocation5 + $0x68] sm:$0xff]  ;;  %v93_v36 = vld [vmem:[#allocation5 + $0x78] sm:$0xff] }
  0x41   :  { %861 = vmatpush1.bf16.msra.mxu1 %v860_v21  ;;  %v219_v37 = vld [vmem:[#allocation5 + $0x468] sm:$0xff]  ;;  %v992_v38 = vpack.c.bf16 %v216_v33, %v214_v32  ;;  %v866_v39 = vpack.c.bf16 %v93_v36, %v91_v35  ;;  %v221_v40 = vld [vmem:[#allocation5 + $0x478] sm:$0xff]  ;;  %v90_v41 = vld [vmem:[#allocation5 + $0x60] sm:$0xff] }
  0x42   :  { %989 = vmatpush1.bf16.msra.mxu0 %v988_v25  ;;  %863 = vmatprep.subr.bf16.mxu1 %v862_v26  ;;  %v92_v42 = vld [vmem:[#allocation5 + $0x70] sm:$0xff]  ;;  %v994_v43 = vpack.c.bf16 %v221_v40, %v219_v37  ;;  %v218_v44 = vld [vmem:[#allocation5 + $0x460] sm:$0xff]  ;;  %v95_v46 = vld [vmem:[#allocation5 + $0x88] sm:$0xff] }
  0x43   :  { %991 = vmatprep.subr.bf16.mxu0 %v990_v30  ;;  %v220_v45 = vld [vmem:[#allocation5 + $0x470] sm:$0xff]  ;;  %v97_v47 = vld [vmem:[#allocation5 + $0x98] sm:$0xff]  ;;  %v223_v48 = vld [vmem:[#allocation5 + $0x488] sm:$0xff]  ;;  %v868_v50 = vpack.c.bf16 %v92_v42, %v90_v41 }
  0x44   :  { %v225_v49 = vld [vmem:[#allocation5 + $0x498] sm:$0xff]  ;;  %v996_v51 = vpack.c.bf16 %v220_v45, %v218_v44  ;;  %v870_v52 = vpack.c.bf16 %v97_v47, %v95_v46  ;;  %v94_v53 = vld [vmem:[#allocation5 + $0x80] sm:$0xff]  ;;  %v96_v54 = vld [vmem:[#allocation5 + $0x90] sm:$0xff] }
  0x45   :  { %865 = vmatpush1.bf16.msra.mxu1 %v864_v34  ;;  %v222_v55 = vld [vmem:[#allocation5 + $0x480] sm:$0xff]  ;;  %v998_v56 = vpack.c.bf16 %v225_v49, %v223_v48  ;;  %v224_v57 = vld [vmem:[#allocation5 + $0x490] sm:$0xff]  ;;  %v99_v58 = vld [vmem:[#allocation5 + $0xa8] sm:$0xff]  ;;  %v872_v62 = vpack.c.bf16 %v96_v54, %v94_v53 }
  0x46   :  { %993 = vmatpush1.bf16.msra.mxu0 %v992_v38  ;;  %867 = vmatprep.subr.bf16.mxu1 %v866_v39  ;;  %v101_v59 = vld [vmem:[#allocation5 + $0xb8] sm:$0xff]  ;;  %v227_v60 = vld [vmem:[#allocation5 + $0x4a8] sm:$0xff]  ;;  %v1000_v63 = vpack.c.bf16 %v224_v57, %v222_v55  ;;  %v98_v1 = vld [vmem:[#allocation5 + $0xa0] sm:$0xff] }
  0x47   :  { %995 = vmatprep.subr.bf16.mxu0 %v994_v43  ;;  %v229_v61 = vld [vmem:[#allocation5 + $0x4b8] sm:$0xff]  ;;  %v874_v0 = vpack.c.bf16 %v101_v59, %v99_v58  ;;  %v100_v2 = vld [vmem:[#allocation5 + $0xb0] sm:$0xff]  ;;  %v226_v3 = vld [vmem:[#allocation5 + $0x4a0] sm:$0xff] }
  0x48   :  { %v1002_v4 = vpack.c.bf16 %v229_v61, %v227_v60  ;;  %v228_v5 = vld [vmem:[#allocation5 + $0x4b0] sm:$0xff]  ;;  %v103_v6 = vld [vmem:[#allocation5 + $0xc8] sm:$0xff]  ;;  %v105_v7 = vld [vmem:[#allocation5 + $0xd8] sm:$0xff]  ;;  %v876_v10 = vpack.c.bf16 %v100_v2, %v98_v1 }
  0x49   :  { %869 = vmatpush1.bf16.msra.mxu1 %v868_v50  ;;  %v231_v8 = vld [vmem:[#allocation5 + $0x4c8] sm:$0xff]  ;;  %v233_v9 = vld [vmem:[#allocation5 + $0x4d8] sm:$0xff]  ;;  %v1004_v11 = vpack.c.bf16 %v228_v5, %v226_v3  ;;  %v878_v12 = vpack.c.bf16 %v105_v7, %v103_v6  ;;  %v102_v13 = vld [vmem:[#allocation5 + $0xc0] sm:$0xff] }
  0x4a   :  { %997 = vmatpush1.bf16.msra.mxu0 %v996_v51  ;;  %871 = vmatprep.subr.bf16.mxu1 %v870_v52  ;;  %v104_v14 = vld [vmem:[#allocation5 + $0xd0] sm:$0xff]  ;;  %v230_v15 = vld [vmem:[#allocation5 + $0x4c0] sm:$0xff]  ;;  %v1006_v16 = vpack.c.bf16 %v233_v9, %v231_v8  ;;  %v107_v18 = vld [vmem:[#allocation5 + $0xe8] sm:$0xff] }
  0x4b   :  { %999 = vmatprep.subr.bf16.mxu0 %v998_v56  ;;  %v232_v17 = vld [vmem:[#allocation5 + $0x4d0] sm:$0xff]  ;;  %v109_v19 = vld [vmem:[#allocation5 + $0xf8] sm:$0xff]  ;;  %v235_v20 = vld [vmem:[#allocation5 + $0x4e8] sm:$0xff]  ;;  %v880_v22 = vpack.c.bf16 %v104_v14, %v102_v13 }
  0x4c   :  { %v237_v21 = vld [vmem:[#allocation5 + $0x4f8] sm:$0xff]  ;;  %v1008_v23 = vpack.c.bf16 %v232_v17, %v230_v15  ;;  %v882_v24 = vpack.c.bf16 %v109_v19, %v107_v18  ;;  %v106_v25 = vld [vmem:[#allocation5 + $0xe0] sm:$0xff]  ;;  %v108_v26 = vld [vmem:[#allocation5 + $0xf0] sm:$0xff] }
  0x4d   :  { %873 = vmatpush1.bf16.msra.mxu1 %v872_v62  ;;  %v234_v27 = vld [vmem:[#allocation5 + $0x4e0] sm:$0xff]  ;;  %v1010_v28 = vpack.c.bf16 %v237_v21, %v235_v20  ;;  %v236_v29 = vld [vmem:[#allocation5 + $0x4f0] sm:$0xff]  ;;  %v111_v30 = vld [vmem:[#allocation5 + $0x108] sm:$0xff]  ;;  %v884_v34 = vpack.c.bf16 %v108_v26, %v106_v25 }
  0x4e   :  { %1001 = vmatpush1.bf16.msra.mxu0 %v1000_v63  ;;  %875 = vmatprep.subr.bf16.mxu1 %v874_v0  ;;  %v113_v31 = vld [vmem:[#allocation5 + $0x118] sm:$0xff]  ;;  %v239_v32 = vld [vmem:[#allocation5 + $0x508] sm:$0xff]  ;;  %v1012_v35 = vpack.c.bf16 %v236_v29, %v234_v27  ;;  %v110_v37 = vld [vmem:[#allocation5 + $0x100] sm:$0xff] }
  0x4f   :  { %1003 = vmatprep.subr.bf16.mxu0 %v1002_v4  ;;  %v241_v33 = vld [vmem:[#allocation5 + $0x518] sm:$0xff]  ;;  %v886_v36 = vpack.c.bf16 %v113_v31, %v111_v30  ;;  %v112_v38 = vld [vmem:[#allocation5 + $0x110] sm:$0xff]  ;;  %v238_v39 = vld [vmem:[#allocation5 + $0x500] sm:$0xff] }
  0x50   :  { %v1014_v40 = vpack.c.bf16 %v241_v33, %v239_v32  ;;  %v240_v41 = vld [vmem:[#allocation5 + $0x510] sm:$0xff]  ;;  %v115_v42 = vld [vmem:[#allocation5 + $0x128] sm:$0xff]  ;;  %v117_v43 = vld [vmem:[#allocation5 + $0x138] sm:$0xff]  ;;  %v888_v46 = vpack.c.bf16 %v112_v38, %v110_v37 }
  0x51   :  { %877 = vmatpush1.bf16.msra.mxu1 %v876_v10  ;;  %v243_v44 = vld [vmem:[#allocation5 + $0x528] sm:$0xff]  ;;  %v245_v45 = vld [vmem:[#allocation5 + $0x538] sm:$0xff]  ;;  %v1016_v47 = vpack.c.bf16 %v240_v41, %v238_v39  ;;  %v890_v48 = vpack.c.bf16 %v117_v43, %v115_v42  ;;  %v114_v49 = vld [vmem:[#allocation5 + $0x120] sm:$0xff] }
  0x52   :  { %1005 = vmatpush1.bf16.msra.mxu0 %v1004_v11  ;;  %879 = vmatprep.subr.bf16.mxu1 %v878_v12  ;;  %v116_v50 = vld [vmem:[#allocation5 + $0x130] sm:$0xff]  ;;  %v242_v51 = vld [vmem:[#allocation5 + $0x520] sm:$0xff]  ;;  %v1018_v52 = vpack.c.bf16 %v245_v45, %v243_v44  ;;  %v119_v54 = vld [vmem:[#allocation5 + $0x148] sm:$0xff] }
  0x53   :  { %1007 = vmatprep.subr.bf16.mxu0 %v1006_v16  ;;  %v244_v53 = vld [vmem:[#allocation5 + $0x530] sm:$0xff]  ;;  %v121_v55 = vld [vmem:[#allocation5 + $0x158] sm:$0xff]  ;;  %v247_v56 = vld [vmem:[#allocation5 + $0x548] sm:$0xff]  ;;  %v892_v58 = vpack.c.bf16 %v116_v50, %v114_v49 }
  0x54   :  { %v249_v57 = vld [vmem:[#allocation5 + $0x558] sm:$0xff]  ;;  %v1020_v59 = vpack.c.bf16 %v244_v53, %v242_v51  ;;  %v894_v60 = vpack.c.bf16 %v121_v55, %v119_v54  ;;  %v118_v61 = vld [vmem:[#allocation5 + $0x140] sm:$0xff]  ;;  %v120_v62 = vld [vmem:[#allocation5 + $0x150] sm:$0xff] }
  0x55   :  { %881 = vmatpush1.bf16.msra.mxu1 %v880_v22  ;;  %v246_v63 = vld [vmem:[#allocation5 + $0x540] sm:$0xff]  ;;  %v1022_v0 = vpack.c.bf16 %v249_v57, %v247_v56  ;;  %v248_v1 = vld [vmem:[#allocation5 + $0x550] sm:$0xff]  ;;  %v123_v2 = vld [vmem:[#allocation5 + $0x168] sm:$0xff]  ;;  %v896_v6 = vpack.c.bf16 %v120_v62, %v118_v61 }
  0x56   :  { %1009 = vmatpush1.bf16.msra.mxu0 %v1008_v23  ;;  %883 = vmatprep.subr.bf16.mxu1 %v882_v24  ;;  %v125_v3 = vld [vmem:[#allocation5 + $0x178] sm:$0xff]  ;;  %v251_v4 = vld [vmem:[#allocation5 + $0x568] sm:$0xff]  ;;  %v122_v7 = vld [vmem:[#allocation5 + $0x160] sm:$0xff]  ;;  %v1024_v8 = vpack.c.bf16 %v248_v1, %v246_v63 }
  0x57   :  { %1011 = vmatprep.subr.bf16.mxu0 %v1010_v28  ;;  %v253_v5 = vld [vmem:[#allocation5 + $0x578] sm:$0xff]  ;;  %v898_v9 = vpack.c.bf16 %v125_v3, %v123_v2  ;;  %v124_v10 = vld [vmem:[#allocation5 + $0x170] sm:$0xff]  ;;  %v250_v11 = vld [vmem:[#allocation5 + $0x560] sm:$0xff] }
  0x58   :  { %v252_v12 = vld [vmem:[#allocation5 + $0x570] sm:$0xff]  ;;  %v1026_v13 = vpack.c.bf16 %v253_v5, %v251_v4  ;;  %v127_v14 = vld [vmem:[#allocation5 + $0x188] sm:$0xff]  ;;  %v129_v15 = vld [vmem:[#allocation5 + $0x198] sm:$0xff]  ;;  %v900_v20 = vpack.c.bf16 %v124_v10, %v122_v7 }
  0x59   :  { %885 = vmatpush1.bf16.msra.mxu1 %v884_v34  ;;  %v63_v16 = vld [vmem:[#allocation2 + $0x8] sm:$0xff]  ;;  %v257_v18 = vld [vmem:[#allocation5 + $0x598] sm:$0xff]  ;;  %v1028_v21 = vpack.c.bf16 %v252_v12, %v250_v11  ;;  %v902_v22 = vpack.c.bf16 %v129_v15, %v127_v14  ;;  %v126_v23 = vld [vmem:[#allocation5 + $0x180] sm:$0xff] }
  0x5a   :  { %1013 = vmatpush1.bf16.msra.mxu0 %v1012_v35  ;;  %887 = vmatprep.subr.bf16.mxu1 %v886_v36  ;;  %v255_v17 = vld [vmem:[#allocation5 + $0x588] sm:$0xff]  ;;  %v128_v24 = vld [vmem:[#allocation5 + $0x190] sm:$0xff]  ;;  %v254_v25 = vld [vmem:[#allocation5 + $0x580] sm:$0xff] }
  0x5b   :  { %1015 = vmatprep.subr.bf16.mxu0 %v1014_v40  ;;  %410 = vmatprep.mubr.f32.mxu1 %v63_v16  ;;  %v67_v19 = vld [vmem:[#allocation2 + $0x28] sm:$0xff]  ;;  %v1030_v26 = vpack.c.bf16 %v257_v18, %v255_v17  ;;  %v256_v27 = vld [vmem:[#allocation5 + $0x590] sm:$0xff]  ;;  %v133_v29 = vld [vmem:[#allocation5 + $0x1b8] sm:$0xff]  ;;  %v904_v32 = vpack.c.bf16 %v128_v24, %v126_v23 }
  0x5c   :  { %564 = vmatprep.mubr.f32.mxu0 %v67_v19  ;;  %v131_v28 = vld [vmem:[#allocation5 + $0x1a8] sm:$0xff]  ;;  %v261_v31 = vld [vmem:[#allocation5 + $0x5b8] sm:$0xff]  ;;  %v1032_v33 = vpack.c.bf16 %v256_v27, %v254_v25  ;;  %v130_v35 = vld [vmem:[#allocation5 + $0x1a0] sm:$0xff] }
  0x5d   :  { %889 = vmatpush1.bf16.msra.mxu1 %v888_v46  ;;  %v259_v30 = vld [vmem:[#allocation5 + $0x5a8] sm:$0xff]  ;;  %v906_v34 = vpack.c.bf16 %v133_v29, %v131_v28  ;;  %v132_v36 = vld [vmem:[#allocation5 + $0x1b0] sm:$0xff]  ;;  %v258_v37 = vld [vmem:[#allocation5 + $0x5a0] sm:$0xff] }
  0x5e   :  { %1017 = vmatpush1.bf16.msra.mxu0 %v1016_v47  ;;  %891 = vmatprep.subr.bf16.mxu1 %v890_v48  ;;  %v1034_v38 = vpack.c.bf16 %v261_v31, %v259_v30  ;;  %v260_v39 = vld [vmem:[#allocation5 + $0x5b0] sm:$0xff]  ;;  %v135_v40 = vld [vmem:[#allocation5 + $0x1c8] sm:$0xff]  ;;  %v137_v41 = vld [vmem:[#allocation5 + $0x1d8] sm:$0xff]  ;;  %v908_v44 = vpack.c.bf16 %v132_v36, %v130_v35 }
  0x5f   :  { %1019 = vmatprep.subr.bf16.mxu0 %v1018_v52  ;;  %v263_v42 = vld [vmem:[#allocation5 + $0x5c8] sm:$0xff]  ;;  %v265_v43 = vld [vmem:[#allocation5 + $0x5d8] sm:$0xff]  ;;  %v1036_v45 = vpack.c.bf16 %v260_v39, %v258_v37  ;;  %v910_v46 = vpack.c.bf16 %v137_v41, %v135_v40  ;;  %v134_v47 = vld [vmem:[#allocation5 + $0x1c0] sm:$0xff] }
  0x60   :  { %v136_v48 = vld [vmem:[#allocation5 + $0x1d0] sm:$0xff]  ;;  %v262_v49 = vld [vmem:[#allocation5 + $0x5c0] sm:$0xff]  ;;  %v1038_v50 = vpack.c.bf16 %v265_v43, %v263_v42  ;;  %v139_v52 = vld [vmem:[#allocation5 + $0x1e8] sm:$0xff] }
  0x61   :  { %893 = vmatpush1.bf16.msra.mxu1 %v892_v58  ;;  %v264_v51 = vld [vmem:[#allocation5 + $0x5d0] sm:$0xff]  ;;  %v141_v53 = vld [vmem:[#allocation5 + $0x1f8] sm:$0xff]  ;;  %v267_v54 = vld [vmem:[#allocation5 + $0x5e8] sm:$0xff]  ;;  %v912_v56 = vpack.c.bf16 %v136_v48, %v134_v47 }
  0x62   :  { %1021 = vmatpush1.bf16.msra.mxu0 %v1020_v59  ;;  %895 = vmatprep.subr.bf16.mxu1 %v894_v60  ;;  %v269_v55 = vld [vmem:[#allocation5 + $0x5f8] sm:$0xff]  ;;  %v1040_v57 = vpack.c.bf16 %v264_v51, %v262_v49  ;;  %v914_v58 = vpack.c.bf16 %v141_v53, %v139_v52  ;;  %v138_v59 = vld [vmem:[#allocation5 + $0x1e0] sm:$0xff]  ;;  %v140_v60 = vld [vmem:[#allocation5 + $0x1f0] sm:$0xff] }
  0x63   :  { %1023 = vmatprep.subr.bf16.mxu0 %v1022_v0  ;;  %v266_v61 = vld [vmem:[#allocation5 + $0x5e0] sm:$0xff]  ;;  %v1042_v62 = vpack.c.bf16 %v269_v55, %v267_v54  ;;  %v268_v63 = vld [vmem:[#allocation5 + $0x5f0] sm:$0xff]  ;;  %v143_v0 = vld [vmem:[#allocation5 + $0x208] sm:$0xff]  ;;  %v916_v4 = vpack.c.bf16 %v140_v60, %v138_v59 }
  0x64   :  { %v145_v1 = vld [vmem:[#allocation5 + $0x218] sm:$0xff]  ;;  %v271_v2 = vld [vmem:[#allocation5 + $0x608] sm:$0xff]  ;;  %v1044_v5 = vpack.c.bf16 %v268_v63, %v266_v61  ;;  %v142_v7 = vld [vmem:[#allocation5 + $0x200] sm:$0xff] }
  0x65   :  { %897 = vmatpush1.bf16.msra.mxu1 %v896_v6  ;;  %v273_v3 = vld [vmem:[#allocation5 + $0x618] sm:$0xff]  ;;  %v918_v6 = vpack.c.bf16 %v145_v1, %v143_v0  ;;  %v272_v11 = vld [vmem:[#allocation5 + $0x610] sm:$0xff]  ;;  %v147_v12 = vld [vmem:[#allocation5 + $0x228] sm:$0xff] }
  0x66   :  { %1025 = vmatpush1.bf16.msra.mxu0 %v1024_v8  ;;  %899 = vmatprep.subr.bf16.mxu1 %v898_v9  ;;  %v144_v8 = vld [vmem:[#allocation5 + $0x210] sm:$0xff]  ;;  %v270_v9 = vld [vmem:[#allocation5 + $0x600] sm:$0xff]  ;;  %v1046_v10 = vpack.c.bf16 %v273_v3, %v271_v2  ;;  %v275_v14 = vld [vmem:[#allocation5 + $0x628] sm:$0xff] }
  0x67   :  { %1027 = vmatprep.subr.bf16.mxu0 %v1026_v13  ;;  %v149_v13 = vld [vmem:[#allocation5 + $0x238] sm:$0xff]  ;;  %v62_v16 = vld [vmem:[#allocation2] sm:$0xff]  ;;  %v920_v17 = vpack.c.bf16 %v144_v8, %v142_v7  ;;  %v1048_v19 = vpack.c.bf16 %v272_v11, %v270_v9  ;;  %v276_v25 = vld [vmem:[#allocation5 + $0x630] sm:$0xff] }
  0x68   :  { %v277_v15 = vld [vmem:[#allocation5 + $0x638] sm:$0xff]  ;;  %v66_v18 = vld [vmem:[#allocation2 + $0x20] sm:$0xff]  ;;  %v279_v28 = vld [vmem:[#allocation5 + $0x648] sm:$0xff] }
  0x69   :  { %901 = vmatpush1.bf16.msra.mxu1 %v900_v20  ;;  %v922_v20 = vpack.c.bf16 %v149_v13, %v147_v12  ;;  %v274_v23 = vld [vmem:[#allocation5 + $0x620] sm:$0xff]  ;;  %v1050_v24 = vpack.c.bf16 %v277_v15, %v275_v14  ;;  %v153_v27 = vld [vmem:[#allocation5 + $0x258] sm:$0xff]  ;;  %v280_v37 = vld [vmem:[#allocation5 + $0x650] sm:$0xff] }
  0x6a   :  { %1029 = vmatpush1.bf16.msra.mxu0 %v1028_v21  ;;  %903 = vmatprep.subr.bf16.mxu1 %v902_v22  ;;  %v146_v21 = vld [vmem:[#allocation5 + $0x220] sm:$0xff]  ;;  %v148_v22 = vld [vmem:[#allocation5 + $0x230] sm:$0xff]  ;;  %v281_v29 = vld [vmem:[#allocation5 + $0x658] sm:$0xff]  ;;  %v1052_v31 = vpack.c.bf16 %v276_v25, %v274_v23 }
  0x6b   :  { %1031 = vmatprep.subr.bf16.mxu0 %v1030_v26  ;;  %v151_v26 = vld [vmem:[#allocation5 + $0x248] sm:$0xff]  ;;  %v924_v30 = vpack.c.bf16 %v148_v22, %v146_v21  ;;  %v278_v35 = vld [vmem:[#allocation5 + $0x640] sm:$0xff]  ;;  %v1054_v36 = vpack.c.bf16 %v281_v29, %v279_v28  ;;  %v157_v39 = vld [vmem:[#allocation5 + $0x278] sm:$0xff] }
  0x6c   :  { %v283_v40 = vld [vmem:[#allocation5 + $0x668] sm:$0xff]  ;;  %v285_v41 = vld [vmem:[#allocation5 + $0x678] sm:$0xff]  ;;  %v1056_v43 = vpack.c.bf16 %v280_v37, %v278_v35  ;;  %v282_v47 = vld [vmem:[#allocation5 + $0x660] sm:$0xff] }
  0x6d   :  { %905 = vmatpush1.bf16.msra.mxu1 %v904_v32  ;;  %v926_v32 = vpack.c.bf16 %v153_v27, %v151_v26  ;;  %v1058_v48 = vpack.c.bf16 %v285_v41, %v283_v40  ;;  %v284_v49 = vld [vmem:[#allocation5 + $0x670] sm:$0xff]  ;;  %v161_v51 = vld [vmem:[#allocation5 + $0x298] sm:$0xff]  ;;  %v287_v52 = vld [vmem:[#allocation5 + $0x688] sm:$0xff] }
  0x6e   :  { %1033 = vmatpush1.bf16.msra.mxu0 %v1032_v33  ;;  %907 = vmatprep.subr.bf16.mxu1 %v906_v34  ;;  %v150_v33 = vld [vmem:[#allocation5 + $0x240] sm:$0xff]  ;;  %v152_v34 = vld [vmem:[#allocation5 + $0x250] sm:$0xff]  ;;  %v289_v53 = vld [vmem:[#allocation5 + $0x698] sm:$0xff]  ;;  %v1060_v55 = vpack.c.bf16 %v284_v49, %v282_v47 }
  0x6f   :  { %1035 = vmatprep.subr.bf16.mxu0 %v1034_v38  ;;  %v155_v38 = vld [vmem:[#allocation5 + $0x268] sm:$0xff]  ;;  %v928_v42 = vpack.c.bf16 %v152_v34, %v150_v33  ;;  %v286_v59 = vld [vmem:[#allocation5 + $0x680] sm:$0xff]  ;;  %v1062_v60 = vpack.c.bf16 %v289_v53, %v287_v52  ;;  %v288_v61 = vld [vmem:[#allocation5 + $0x690] sm:$0xff] }
  0x70   :  { %v165_v63 = vld [vmem:[#allocation5 + $0x2b8] sm:$0xff]  ;;  %v291_v0 = vld [vmem:[#allocation5 + $0x6a8] sm:$0xff]  ;;  %v1064_v3 = vpack.c.bf16 %v288_v61, %v286_v59  ;;  %v290_v7 = vld [vmem:[#allocation5 + $0x6a0] sm:$0xff] }
  0x71   :  { %909 = vmatpush1.bf16.msra.mxu1 %v908_v44  ;;  %v930_v44 = vpack.c.bf16 %v157_v39, %v155_v38  ;;  %v293_v1 = vld [vmem:[#allocation5 + $0x6b8] sm:$0xff]  ;;  %v292_v9 = vld [vmem:[#allocation5 + $0x6b0] sm:$0xff]  ;;  %v295_v12 = vld [vmem:[#allocation5 + $0x6c8] sm:$0xff] }
  0x72   :  { %1037 = vmatpush1.bf16.msra.mxu0 %v1036_v45  ;;  %911 = vmatprep.subr.bf16.mxu1 %v910_v46  ;;  %v154_v45 = vld [vmem:[#allocation5 + $0x260] sm:$0xff]  ;;  %v156_v46 = vld [vmem:[#allocation5 + $0x270] sm:$0xff]  ;;  %v1066_v8 = vpack.c.bf16 %v293_v1, %v291_v0  ;;  %v169_v11 = vld [vmem:[#allocation5 + $0x2d8] sm:$0xff] }
  0x73   :  { %1039 = vmatprep.subr.bf16.mxu0 %v1038_v50  ;;  %v159_v50 = vld [vmem:[#allocation5 + $0x288] sm:$0xff]  ;;  %v932_v54 = vpack.c.bf16 %v156_v46, %v154_v45  ;;  %v297_v13 = vld [vmem:[#allocation5 + $0x6d8] sm:$0xff]  ;;  %v166_v14 = vld [vmem:[#allocation5 + $0x2c0] sm:$0xff] }
  0x74   :  { %v168_v21 = vld [vmem:[#allocation5 + $0x2d0] sm:$0xff]  ;;  %v294_v22 = vld [vmem:[#allocation5 + $0x6c0] sm:$0xff]  ;;  %v171_v26 = vld [vmem:[#allocation5 + $0x2e8] sm:$0xff] }
  0x75   :  { %913 = vmatpush1.bf16.msra.mxu1 %v912_v56  ;;  %v934_v56 = vpack.c.bf16 %v161_v51, %v159_v50  ;;  %v74_v23 = vld [vmem:[#allocation2 + $0x60] sm:$0xff]  ;;  %v296_v25 = vld [vmem:[#allocation5 + $0x6d0] sm:$0xff]  ;;  %v173_v27 = vld [vmem:[#allocation5 + $0x2f8] sm:$0xff] }
  0x76   :  { %1041 = vmatpush1.bf16.msra.mxu0 %v1040_v57  ;;  %915 = vmatprep.subr.bf16.mxu1 %v914_v58  ;;  %v158_v57 = vld [vmem:[#allocation5 + $0x280] sm:$0xff]  ;;  %v160_v58 = vld [vmem:[#allocation5 + $0x290] sm:$0xff]  ;;  %v299_v28 = vld [vmem:[#allocation5 + $0x6e8] sm:$0xff]  ;;  %v1072_v33 = vpack.c.bf16 %v296_v25, %v294_v22  ;;  %v946_v34 = vpack.c.bf16 %v173_v27, %v171_v26 }
  0x77   :  { %1043 = vmatprep.subr.bf16.mxu0 %v1042_v62  ;;  %v163_v62 = vld [vmem:[#allocation5 + $0x2a8] sm:$0xff]  ;;  %v936_v2 = vpack.c.bf16 %v160_v58, %v158_v57  ;;  %v301_v29 = vld [vmem:[#allocation5 + $0x6f8] sm:$0xff]  ;;  %v170_v35 = vld [vmem:[#allocation5 + $0x2e0] sm:$0xff] }
  0x78   :  { %v298_v37 = vld [vmem:[#allocation5 + $0x6e0] sm:$0xff]  ;;  %v1074_v38 = vpack.c.bf16 %v301_v29, %v299_v28  ;;  %v300_v39 = vld [vmem:[#allocation5 + $0x6f0] sm:$0xff]  ;;  %v175_v40 = vld [vmem:[#allocation5 + $0x308] sm:$0xff] }
  0x79   :  { %917 = vmatpush1.bf16.msra.mxu1 %v916_v4  ;;  %v938_v4 = vpack.c.bf16 %v165_v63, %v163_v62  ;;  %v177_v41 = vld [vmem:[#allocation5 + $0x318] sm:$0xff]  ;;  %v1076_v45 = vpack.c.bf16 %v300_v39, %v298_v37  ;;  %v174_v47 = vld [vmem:[#allocation5 + $0x300] sm:$0xff]  ;;  %v304_v51 = vld [vmem:[#allocation5 + $0x710] sm:$0xff] }
  0x7a   :  { %1045 = vmatpush1.bf16.msra.mxu0 %v1044_v5  ;;  %919 = vmatprep.subr.bf16.mxu1 %v918_v6  ;;  %v162_v5 = vld [vmem:[#allocation5 + $0x2a0] sm:$0xff]  ;;  %v164_v6 = vld [vmem:[#allocation5 + $0x2b0] sm:$0xff]  ;;  %v950_v46 = vpack.c.bf16 %v177_v41, %v175_v40  ;;  %v179_v52 = vld [vmem:[#allocation5 + $0x328] sm:$0xff] }
  0x7b   :  { %1047 = vmatprep.subr.bf16.mxu0 %v1046_v10  ;;  %v167_v10 = vld [vmem:[#allocation5 + $0x2c8] sm:$0xff]  ;;  %v940_v15 = vpack.c.bf16 %v164_v6, %v162_v5  ;;  %v302_v49 = vld [vmem:[#allocation5 + $0x700] sm:$0xff]  ;;  %v181_v53 = vld [vmem:[#allocation5 + $0x338] sm:$0xff] }
  0x7c   :  { %411 = vmatmul.mubr.f32.vlgmr.msra.gmra.mrb[0].mxu1 %v62_v16  ;;  %v71_v16 = vld [vmem:[#allocation2 + $0x48] sm:$0xff]  ;;  %v1080_v57 = vpack.c.bf16 %v304_v51, %v302_v49  ;;  %v954_v58 = vpack.c.bf16 %v181_v53, %v179_v52  ;;  %v178_v59 = vld [vmem:[#allocation5 + $0x320] sm:$0xff]  ;;  %v308_v63 = vld [vmem:[#allocation5 + $0x730] sm:$0xff] }
  0x7d   :  { %921 = vmatpush1.bf16.msra.mxu1 %v920_v17  ;;  %565 = vmatmul.mubr.f32.vlgmr.msra.gmra.mrb[0].mxu0 %v66_v18  ;;  %v75_v17 = vld [vmem:[#allocation2 + $0x68] sm:$0xff]  ;;  %v70_v18 = vld [vmem:[#allocation2 + $0x40] sm:$0xff]  ;;  %v185_v1 = vld [vmem:[#allocation5 + $0x358] sm:$0xff] }
  0x7e   :  { %1049 = vmatpush1.bf16.msra.mxu0 %v1048_v19  ;;  %923 = vmatprep.subr.bf16.mxu1 %v922_v20  ;;  %v1068_v19 = vpack.c.bf16 %v292_v9, %v290_v7  ;;  %v942_v20 = vpack.c.bf16 %v169_v11, %v167_v10  ;;  %v306_v61 = vld [vmem:[#allocation5 + $0x720] sm:$0xff]  ;;  %v183_v0 = vld [vmem:[#allocation5 + $0x348] sm:$0xff]  ;;  %v312_v11 = vld [vmem:[#allocation5 + $0x750] sm:$0xff] }
  0x7f   :  { %1051 = vmatprep.subr.bf16.mxu0 %v1050_v24  ;;  %v1070_v24 = vpack.c.bf16 %v297_v13, %v295_v12  ;;  %416 = vmatprep.mubr.f32.mxu1 %v71_v16  ;;  %v1084_v5 = vpack.c.bf16 %v308_v63, %v306_v61  ;;  %v958_v6 = vpack.c.bf16 %v185_v1, %v183_v0  ;;  %v182_v7 = vld [vmem:[#allocation5 + $0x340] sm:$0xff]  ;;  %v187_v12 = vld [vmem:[#allocation5 + $0x368] sm:$0xff]  ;;  %v189_v13 = vld [vmem:[#allocation5 + $0x378] sm:$0xff] }
  0x80   :  { %570 = vmatprep.mubr.f32.mxu0 %v75_v17  ;;  %417 = vmatmul.mubr.f32.gmra.mrb[2].mxu1 %v70_v18  ;;  %v310_v9 = vld [vmem:[#allocation5 + $0x740] sm:$0xff]  ;;  %v962_v18 = vpack.c.bf16 %v189_v13, %v187_v12  ;;  %v193_v25 = vld [vmem:[#allocation5 + $0x398] sm:$0xff]  ;;  %v319_v26 = vld [vmem:[#allocation5 + $0x788] sm:$0xff] }
  0x81   :  { %925 = vmatpush1.bf16.msra.mxu1 %v924_v30  ;;  %v944_v30 = vpack.c.bf16 %v168_v21, %v166_v14  ;;  %571 = vmatmul.mubr.f32.gmra.mrb[2].mxu0 %v74_v23  ;;  %v315_v14 = vld [vmem:[#allocation5 + $0x768] sm:$0xff]  ;;  %v1088_v17 = vpack.c.bf16 %v312_v11, %v310_v9  ;;  %v314_v21 = vld [vmem:[#allocation5 + $0x760] sm:$0xff]  ;;  %v316_v23 = vld [vmem:[#allocation5 + $0x770] sm:$0xff] }
  0x82   :  { %1053 = vmatpush1.bf16.msra.mxu0 %v1052_v31  ;;  %927 = vmatprep.subr.bf16.mxu1 %v926_v32  ;;  %v65_v31 = vld [vmem:[#allocation2 + $0x18] sm:$0xff]  ;;  %v1092_v29 = vpack.c.bf16 %v316_v23, %v314_v21  ;;  %v675_v9 = vld [vmem:[#allocation7 + $0x88] sm:$0xff]  ;;  %v658_v13 = vld [vmem:[#allocation7] sm:$0xff] }
  0x83   :  { %1055 = vmatprep.subr.bf16.mxu0 %v1054_v36  ;;  %v69_v32 = vld [vmem:[#allocation2 + $0x38] sm:$0xff]  ;;  %v172_v36 = vld [vmem:[#allocation5 + $0x2f0] sm:$0xff]  ;;  %487 = vmatprep.mubr.f32.mxu1 %v65_v31  ;;  %v190_v31 = vld [vmem:[#allocation5 + $0x380] sm:$0xff] }
  0x84   :  { %641 = vmatprep.mubr.f32.mxu0 %v69_v32  ;;  %v321_v27 = vld [vmem:[#allocation5 + $0x798] sm:$0xff]  ;;  %v192_v32 = vld [vmem:[#allocation5 + $0x390] sm:$0xff] }
  0x85   :  { %929 = vmatpush1.bf16.msra.mxu1 %v928_v42  ;;  %v303_v42 = vld [vmem:[#allocation5 + $0x708] sm:$0xff]  ;;  %v197_v37 = vld [vmem:[#allocation5 + $0x3b8] sm:$0xff]  ;;  %v968_v40 = vpack.c.bf16 %v192_v32, %v190_v31  ;;  %v660_v23 = vld [vmem:[#allocation7 + $0x10] sm:$0xff] }
  0x86   :  { %1057 = vmatpush1.bf16.msra.mxu0 %v1056_v43  ;;  %931 = vmatprep.subr.bf16.mxu1 %v930_v44  ;;  %v305_v43 = vld [vmem:[#allocation5 + $0x718] sm:$0xff]  ;;  %v948_v44 = vpack.c.bf16 %v172_v36, %v170_v35  ;;  %v320_v35 = vld [vmem:[#allocation5 + $0x790] sm:$0xff]  ;;  %v195_v36 = vld [vmem:[#allocation5 + $0x3a8] sm:$0xff] }
  0x87   :  { %1059 = vmatprep.subr.bf16.mxu0 %v1058_v48  ;;  %v176_v48 = vld [vmem:[#allocation5 + $0x310] sm:$0xff]  ;;  %v1078_v50 = vpack.c.bf16 %v305_v43, %v303_v42  ;;  %v325_v39 = vld [vmem:[#allocation5 + $0x7b8] sm:$0xff]  ;;  %v970_v42 = vpack.c.bf16 %v197_v37, %v195_v36  ;;  %v194_v43 = vld [vmem:[#allocation5 + $0x3a0] sm:$0xff] }
  0x88   :  { %v201_v49 = vld [vmem:[#allocation5 + $0x3d8] sm:$0xff]  ;;  %v662_v31 = vld [vmem:[#allocation7 + $0x20] sm:$0xff]  ;;  %v663_v32 = vld [vmem:[#allocation7 + $0x28] sm:$0xff] }
  0x89   :  { %933 = vmatpush1.bf16.msra.mxu1 %v932_v54  ;;  %v307_v54 = vld [vmem:[#allocation5 + $0x728] sm:$0xff]  ;;  %v329_v51 = vld [vmem:[#allocation5 + $0x7d8] sm:$0xff]  ;;  %v664_v37 = vld [vmem:[#allocation7 + $0x30] sm:$0xff] }
  0x8a   :  { %1061 = vmatpush1.bf16.msra.mxu0 %v1060_v55  ;;  %935 = vmatprep.subr.bf16.mxu1 %v934_v56  ;;  %v309_v55 = vld [vmem:[#allocation5 + $0x738] sm:$0xff]  ;;  %v952_v56 = vpack.c.bf16 %v176_v48, %v174_v47  ;;  %v324_v47 = vld [vmem:[#allocation5 + $0x7b0] sm:$0xff]  ;;  %v199_v48 = vld [vmem:[#allocation5 + $0x3c8] sm:$0xff] }
  0x8b   :  { %1063 = vmatprep.subr.bf16.mxu0 %v1062_v60  ;;  %v180_v60 = vld [vmem:[#allocation5 + $0x330] sm:$0xff]  ;;  %v1082_v62 = vpack.c.bf16 %v309_v55, %v307_v54  ;;  %v974_v54 = vpack.c.bf16 %v201_v49, %v199_v48  ;;  %v198_v55 = vld [vmem:[#allocation5 + $0x3c0] sm:$0xff]  ;;  %v205_v61 = vld [vmem:[#allocation5 + $0x3f8] sm:$0xff] }
  0x8c   :  { %v333_v63 = vld [vmem:[#allocation5 + $0x7f8] sm:$0xff]  ;;  %v668_v49 = vld [vmem:[#allocation7 + $0x50] sm:$0xff] }
  0x8d   :  { %937 = vmatpush1.bf16.msra.mxu1 %v936_v2  ;;  %v311_v2 = vld [vmem:[#allocation5 + $0x748] sm:$0xff]  ;;  %v77_v21 = vld [vmem:[#allocation2 + $0x78] sm:$0xff] }
  0x8e   :  { %1065 = vmatpush1.bf16.msra.mxu0 %v1064_v3  ;;  %939 = vmatprep.subr.bf16.mxu1 %v938_v4  ;;  %v313_v3 = vld [vmem:[#allocation5 + $0x758] sm:$0xff]  ;;  %v956_v4 = vpack.c.bf16 %v180_v60, %v178_v59  ;;  %v328_v59 = vld [vmem:[#allocation5 + $0x7d0] sm:$0xff]  ;;  %v203_v60 = vld [vmem:[#allocation5 + $0x3e8] sm:$0xff] }
  0x8f   :  { %1067 = vmatprep.subr.bf16.mxu0 %v1066_v8  ;;  %v184_v8 = vld [vmem:[#allocation5 + $0x350] sm:$0xff]  ;;  %v1086_v10 = vpack.c.bf16 %v313_v3, %v311_v2  ;;  %v978_v2 = vpack.c.bf16 %v205_v61, %v203_v60  ;;  %v202_v3 = vld [vmem:[#allocation5 + $0x3e0] sm:$0xff] }
  0x90   :  { %v960_v16 = vpack.c.bf16 %v184_v8, %v182_v7  ;;  %v332_v7 = vld [vmem:[#allocation5 + $0x7f0] sm:$0xff]  ;;  %v674_v8 = vld [vmem:[#allocation7 + $0x80] sm:$0xff] }
  0x91   :  { %941 = vmatpush1.bf16.msra.mxu1 %v940_v15  ;;  %v317_v15 = vld [vmem:[#allocation5 + $0x778] sm:$0xff]  ;;  %v1110_v12 = vpack.c.bf16 %v675_v9, %v674_v8  ;;  %v672_v61 = vld [vmem:[#allocation7 + $0x70] sm:$0xff] }
  0x92   :  { %1069 = vmatpush1.bf16.msra.mxu0 %v1068_v19  ;;  %943 = vmatprep.subr.bf16.mxu1 %v942_v20  ;;  %v186_v19 = vld [vmem:[#allocation5 + $0x360] sm:$0xff]  ;;  %v188_v20 = vld [vmem:[#allocation5 + $0x370] sm:$0xff]  ;;  %v1090_v22 = vpack.c.bf16 %v317_v15, %v315_v14  ;;  %v659_v14 = vld [vmem:[#allocation7 + $0x8] sm:$0xff] }
  0x93   :  { %1071 = vmatprep.subr.bf16.mxu0 %v1070_v24  ;;  %v191_v24 = vld [vmem:[#allocation5 + $0x388] sm:$0xff]  ;;  %v964_v28 = vpack.c.bf16 %v188_v20, %v186_v19  ;;  %v676_v15 = vld [vmem:[#allocation7 + $0x90] sm:$0xff]  ;;  %v73_v19 = vld [vmem:[#allocation2 + $0x58] sm:$0xff]  ;;  %v1112_v20 = vpack.c.bf16 %v659_v14, %v658_v13 }
  0x95   :  { %945 = vmatpush1.bf16.msra.mxu1 %v944_v30  ;;  %v966_v30 = vpack.c.bf16 %v193_v25, %v191_v24  ;;  %v661_v24 = vld [vmem:[#allocation7 + $0x18] sm:$0xff]  ;;  %v678_v25 = vld [vmem:[#allocation7 + $0xa0] sm:$0xff] }
  0x96   :  { %1073 = vmatpush1.bf16.msra.mxu0 %v1072_v33  ;;  %947 = vmatprep.subr.bf16.mxu1 %v946_v34  ;;  %v318_v33 = vld [vmem:[#allocation5 + $0x780] sm:$0xff]  ;;  %v1094_v34 = vpack.c.bf16 %v321_v27, %v319_v26  ;;  %v679_v26 = vld [vmem:[#allocation7 + $0xa8] sm:$0xff]  ;;  %v72_v27 = vld [vmem:[#allocation2 + $0x50] sm:$0xff] }
  0x97   :  { %1075 = vmatprep.subr.bf16.mxu0 %v1074_v38  ;;  %v323_v38 = vld [vmem:[#allocation5 + $0x7a8] sm:$0xff]  ;;  %v1096_v41 = vpack.c.bf16 %v320_v35, %v318_v33  ;;  %v680_v33 = vld [vmem:[#allocation7 + $0xb0] sm:$0xff]  ;;  %v1120_v35 = vpack.c.bf16 %v663_v32, %v662_v31 }
  0x99   :  { %949 = vmatpush1.bf16.msra.mxu1 %v948_v44  ;;  %v196_v44 = vld [vmem:[#allocation5 + $0x3b0] sm:$0xff] }
  0x9a   :  { %1077 = vmatpush1.bf16.msra.mxu0 %v1076_v45  ;;  %951 = vmatprep.subr.bf16.mxu1 %v950_v46  ;;  %v322_v45 = vld [vmem:[#allocation5 + $0x7a0] sm:$0xff]  ;;  %v1098_v46 = vpack.c.bf16 %v325_v39, %v323_v38  ;;  %v972_v52 = vpack.c.bf16 %v196_v44, %v194_v43  ;;  %v665_v38 = vld [vmem:[#allocation7 + $0x38] sm:$0xff]  ;;  %v667_v44 = vld [vmem:[#allocation7 + $0x48] sm:$0xff] }
  0x9b   :  { %1079 = vmatprep.subr.bf16.mxu0 %v1078_v50  ;;  %v327_v50 = vld [vmem:[#allocation5 + $0x7c8] sm:$0xff]  ;;  %v1100_v53 = vpack.c.bf16 %v324_v47, %v322_v45  ;;  %v682_v39 = vld [vmem:[#allocation7 + $0xc0] sm:$0xff]  ;;  %v684_v45 = vld [vmem:[#allocation7 + $0xd0] sm:$0xff] }
  0x9c   :  { %v666_v43 = vld [vmem:[#allocation7 + $0x40] sm:$0xff] }
  0x9d   :  { %953 = vmatpush1.bf16.msra.mxu1 %v952_v56  ;;  %v200_v56 = vld [vmem:[#allocation5 + $0x3d0] sm:$0xff]  ;;  %v1128_v47 = vpack.c.bf16 %v667_v44, %v666_v43 }
  0x9e   :  { %1081 = vmatpush1.bf16.msra.mxu0 %v1080_v57  ;;  %955 = vmatprep.subr.bf16.mxu1 %v954_v58  ;;  %v326_v57 = vld [vmem:[#allocation5 + $0x7c0] sm:$0xff]  ;;  %v1102_v58 = vpack.c.bf16 %v329_v51, %v327_v50  ;;  %v976_v0 = vpack.c.bf16 %v200_v56, %v198_v55  ;;  %v669_v50 = vld [vmem:[#allocation7 + $0x58] sm:$0xff]  ;;  %v671_v56 = vld [vmem:[#allocation7 + $0x68] sm:$0xff] }
  0x9f   :  { %1083 = vmatprep.subr.bf16.mxu0 %v1082_v62  ;;  %v331_v62 = vld [vmem:[#allocation5 + $0x7e8] sm:$0xff]  ;;  %v1104_v1 = vpack.c.bf16 %v328_v59, %v326_v57  ;;  %v1132_v51 = vpack.c.bf16 %v669_v50, %v668_v49  ;;  %v670_v55 = vld [vmem:[#allocation7 + $0x60] sm:$0xff]  ;;  %v689_v59 = vld [vmem:[#allocation7 + $0xf8] sm:$0xff] }
  0xa0   :  { %v1136_v57 = vpack.c.bf16 %v671_v56, %v670_v55 }
  0xa1   :  { %957 = vmatpush1.bf16.msra.mxu1 %v956_v4  ;;  %v204_v4 = vld [vmem:[#allocation5 + $0x3f0] sm:$0xff] }
  0xa2   :  { %1085 = vmatpush1.bf16.msra.mxu0 %v1084_v5  ;;  %959 = vmatprep.subr.bf16.mxu1 %v958_v6  ;;  %v1106_v5 = vpack.c.bf16 %v333_v63, %v331_v62  ;;  %v330_v6 = vld [vmem:[#allocation5 + $0x7e0] sm:$0xff]  ;;  %v673_v62 = vld [vmem:[#allocation7 + $0x78] sm:$0xff] }
  0xa3   :  { %1087 = vmatprep.subr.bf16.mxu0 %v1086_v10  ;;  %v980_v10 = vpack.c.bf16 %v204_v4, %v202_v3  ;;  %v1108_v11 = vpack.c.bf16 %v332_v7, %v330_v6  ;;  %v1140_v63 = vpack.c.bf16 %v673_v62, %v672_v61  ;;  %v334_v3 = vld [vmem:[%s1388_s2] sm:$0x3] }
  0xa5   :  { %961 = vmatpush1.bf16.msra.mxu1 %v960_v16  ;;  %v677_v16 = vld [vmem:[#allocation7 + $0x98] sm:$0xff] }
  0xa6   :  { %1089 = vmatpush1.bf16.msra.mxu0 %v1088_v17  ;;  %963 = vmatprep.subr.bf16.mxu1 %v962_v18  ;;  %v64_v17 = vld [vmem:[#allocation2 + $0x10] sm:$0xff] }
  0xa7   :  { %1091 = vmatprep.subr.bf16.mxu0 %v1090_v22  ;;  %v68_v18 = vld [vmem:[#allocation2 + $0x30] sm:$0xff]  ;;  %v1114_v22 = vpack.c.bf16 %v677_v16, %v676_v15 }
  0xa9   :  { %965 = vmatpush1.bf16.msra.mxu1 %v964_v28  ;;  %v76_v28 = vld [vmem:[#allocation2 + $0x70] sm:$0xff] }
  0xaa   :  { %1093 = vmatpush1.bf16.msra.mxu0 %v1092_v29  ;;  %967 = vmatprep.subr.bf16.mxu1 %v966_v30  ;;  %v1116_v29 = vpack.c.bf16 %v661_v24, %v660_v23  ;;  %v1118_v30 = vpack.c.bf16 %v679_v26, %v678_v25 }
  0xab   :  { %1095 = vmatprep.subr.bf16.mxu0 %v1094_v34  ;;  %v681_v34 = vld [vmem:[#allocation7 + $0xb8] sm:$0xff] }
  0xac   :  { %v1122_v36 = vpack.c.bf16 %v681_v34, %v680_v33 }
  0xad   :  { %969 = vmatpush1.bf16.msra.mxu1 %v968_v40  ;;  %v683_v40 = vld [vmem:[#allocation7 + $0xc8] sm:$0xff] }
  0xae   :  { %1097 = vmatpush1.bf16.msra.mxu0 %v1096_v41  ;;  %971 = vmatprep.subr.bf16.mxu1 %v970_v42  ;;  %v1124_v41 = vpack.c.bf16 %v665_v38, %v664_v37  ;;  %v1126_v42 = vpack.c.bf16 %v683_v40, %v682_v39 }
  0xaf   :  { %1099 = vmatprep.subr.bf16.mxu0 %v1098_v46  ;;  %v685_v46 = vld [vmem:[#allocation7 + $0xd8] sm:$0xff] }
  0xb0   :  { %v1130_v48 = vpack.c.bf16 %v685_v46, %v684_v45 }
  0xb1   :  { %973 = vmatpush1.bf16.msra.mxu1 %v972_v52  ;;  %v686_v52 = vld [vmem:[#allocation7 + $0xe0] sm:$0xff] }
  0xb2   :  { %1101 = vmatpush1.bf16.msra.mxu0 %v1100_v53  ;;  %975 = vmatprep.subr.bf16.mxu1 %v974_v54  ;;  %v687_v53 = vld [vmem:[#allocation7 + $0xe8] sm:$0xff] }
  0xb3   :  { %1103 = vmatprep.subr.bf16.mxu0 %v1102_v58  ;;  %v1134_v54 = vpack.c.bf16 %v687_v53, %v686_v52  ;;  %v688_v58 = vld [vmem:[#allocation7 + $0xf0] sm:$0xff] }
  0xb4   :  { %v1138_v60 = vpack.c.bf16 %v689_v59, %v688_v58 }
  0xb5   :  { %977 = vmatpush1.bf16.msra.mxu1 %v976_v0  ;;  %v336_v0 = vlaneseq }
  0xb6   :  { %1105 = vmatpush1.bf16.msra.mxu0 %v1104_v1  ;;  %979 = vmatprep.subr.bf16.mxu1 %v978_v2 }
  0xb7   :  { %1107 = vmatprep.subr.bf16.mxu0 %v1106_v5  ;;  %v337_v1 = vshrl.u32 %v336_v0, 7 }
  0xb9   :  { %981 = vmatpush1.bf16.msra.mxu1 %v980_v10  ;;  %v338_v2 = vsub.s32 0, %v337_v1  ;;  %v342_v4 = vsub.s32 1, %v337_v1 }
  0xba   :  { %1109 = vmatpush1.bf16.msra.mxu0 %v1108_v11  ;;  %1142 = vmatprep.subr.bf16.mxu1 %v1110_v12 }
  0xbb   :  { %1111 = vmatprep.subr.bf16.mxu0 %v1110_v12  ;;  %v339_v5 = vrot.slane %v334_v3, %v338_v2  ;;  %v343_v6 = vrot.slane %v334_v3, %v342_v4 }
  0xbc   :  { %488 = vmatmul.mubr.f32.vlgmr.msra.gmra.mrb[0].mxu1 %v64_v17 }
  0xbd   :  { %642 = vmatmul.mubr.f32.vlgmr.msra.gmra.mrb[0].mxu0 %v68_v18  ;;  %493 = vmatprep.mubr.f32.mxu1 %v73_v19 }
  0xbe   :  { %647 = vmatprep.mubr.f32.mxu0 %v77_v21  ;;  %1113 = vmatpush3.bf16.msra.mxu0 %v1112_v20 }
  0xbf   :  { %1115 = vmatprep.subr.bf16.mxu0 %v1114_v22  ;;  %1150 = vmatpush3.bf16.msra.mxu1 %v1112_v20 }
  0xc0   :  { %494 = vmatmul.mubr.f32.gmra.mrb[2].mxu1 %v72_v27  ;;  %1143 = vmatprep.subr.bf16.mxu1 %v1114_v22  ;;  %v773_v27 = vand.u32 127, %v336_v0 }
  0xc1   :  { %648 = vmatmul.mubr.f32.gmra.mrb[2].mxu0 %v76_v28 }
  0xc2   :  { %1117 = vmatpush3.bf16.msra.mxu0 %v1116_v29  ;;  %vm774_vm0 = vcmp.lt.s32.totalorder %v773_v27, 10 }
  0xc3   :  { %1119 = vmatprep.subr.bf16.mxu0 %v1118_v30  ;;  %1151 = vmatpush3.bf16.msra.mxu1 %v1116_v29 }
  0xc4   :  { %1144 = vmatprep.subr.bf16.mxu1 %v1118_v30  ;;  %v815_v30 = vld [vmem:[%s1390_s4] ss:$0 sm:$0xff]  ;;  %s1295_s4 = smov [#allocation8]  }
  0xc5   :  { %s802_s10 = sshll.u32 %s1295_s4, 4  ;;  %s803_s10 = int_to_ptr.vmem [resolvable:$true] %s802_s10 }
  0xc6   :  { %1121 = vmatpush3.bf16.msra.mxu0 %v1120_v35  ;;  %s1258_s11 = scalar_lea.vmem %s803_s10, 256  ;;  %p1263_p11 = scmp.lt.s32.totalorder %s803_s10, %s803_s10 }
  0xc7   :  { %1123 = vmatprep.subr.bf16.mxu0 %v1122_v36  ;;  %1152 = vmatpush3.bf16.msra.mxu1 %v1120_v35  ;;  %p1259_p10 = scmp.ne.s32.totalorder %s803_s10, %s1258_s11  ;;  %p1264_p12 = scmp.lt.s32.totalorder %s1258_s11, %s1258_s11 }
  0xc8   :  { %1145 = vmatprep.subr.bf16.mxu1 %v1122_v36 }
  0xc9   :  { %p1265_p13 = por %p1264_p12, %p1263_p11 }
  0xca   :  { %1125 = vmatpush3.bf16.msra.mxu0 %v1124_v41 }
  0xcb   :  { %1127 = vmatprep.subr.bf16.mxu0 %v1126_v42  ;;  %1153 = vmatpush3.bf16.msra.mxu1 %v1124_v41  ;;  %p1266_p0 = pnand %p1265_p13, %p1259_p10 }
  0xcc   :  { %1146 = vmatprep.subr.bf16.mxu1 %v1126_v42 }
  0xce   :  { %1129 = vmatpush3.bf16.msra.mxu0 %v1128_v47 }
  0xcf   :  { %1131 = vmatprep.subr.bf16.mxu0 %v1130_v48  ;;  %1154 = vmatpush3.bf16.msra.mxu1 %v1128_v47 }
  0xd0   :  { %1147 = vmatprep.subr.bf16.mxu1 %v1130_v48 }
  0xd2   :  { %1133 = vmatpush3.bf16.msra.mxu0 %v1132_v51 }
  0xd3   :  { %1155 = vmatpush3.bf16.msra.mxu1 %v1132_v51  ;;  %1135 = vmatprep.subr.bf16.mxu0 %v1134_v54 }
  0xd4   :  { %1148 = vmatprep.subr.bf16.mxu1 %v1134_v54 }
  0xd6   :  { %1137 = vmatpush3.bf16.msra.mxu0 %v1136_v57 }
  0xd7   :  { %1156 = vmatpush3.bf16.msra.mxu1 %v1136_v57  ;;  %1139 = vmatprep.subr.bf16.mxu0 %v1138_v60 }
  0xd8   :  { %1149 = vmatprep.subr.bf16.mxu1 %v1138_v60 }
  0xda   :  { %1141 = vmatpush3.bf16.msra.mxu0 %v1140_v63 }
  0xdb   :  { %1157 = vmatpush3.bf16.msra.mxu1 %v1140_v63 }
 0x18f   :  { %v489_v7 = vpop.f32.mrb[0].mxu1 }
 0x190   :  { %v1158_v8 = vadd.f32 %v489_v7, %v339_v5  ;;  %v643_v9 = vpop.f32.mrb[0].mxu0  ;;  %v491_v10 = vpop.f32.mrb[1].mxu1 }
 0x191   :  { %v1160_v11 = vadd.f32 %v491_v10, %v343_v6  ;;  %v645_v12 = vpop.f32.mrb[1].mxu0 }
 0x192   :  { %v1159_v13 = vadd.f32 %v1158_v8, %v643_v9 }
 0x193   :  { %v1161_v14 = vadd.f32 %v1160_v11, %v645_v12  ;;  %v495_v15 = vpop.f32.mrb[2].mxu1 }
 0x194   :  { %v1162_v16 = vadd.f32 %v495_v15, %v339_v5  ;;  %v649_v17 = vpop.f32.mrb[2].mxu0  ;;  %v497_v18 = vpop.f32.mrb[3].mxu1  ;;  %v654_v22 = vmax.f32 %v1159_v13, 0.0 }
 0x195   :  { %v655_v19 = vmax.f32 %v1161_v14, 0.0  ;;  %v1164_v20 = vadd.f32 %v497_v18, %v343_v6  ;;  %v651_v21 = vpop.f32.mrb[3].mxu0 }
 0x196   :  { %v1163_v23 = vadd.f32 %v1162_v16, %v649_v17 }
 0x197   :  { %v1165_v24 = vadd.f32 %v1164_v20, %v651_v21  ;;  %761 = vmatprep.mubr.f32.mxu0 %v655_v19 }
 0x198   :  { %762 = vmatmul.mubr.f32.vlgmr.msra.gmra.mrb[4].mxu0 %v654_v22  ;;  %v656_v26 = vmax.f32 %v1163_v23, 0.0 }
 0x199   :  { %v657_v25 = vmax.f32 %v1165_v24, 0.0 }
 0x19b   :  { %766 = vmatprep.mubr.f32.mxu1 %v657_v25 }
 0x19c   :  { %767 = vmatmul.mubr.f32.vlgmr.msra.gmra.mrb[4].mxu1 %v656_v26 }
 0x26b   :  { %v848_v28 = vpop.f32.mrb[4].mxu0 }
 0x26c   :  { %v849_v29 = vpop.f32.mrb[5].mxu0 }
 0x26d   :  { %v850_v31 = vadd.f32 %v849_v29, %v848_v28 }
 0x26f   :  { %v851_v32 = vpop.f32.mrb[4].mxu1  ;;  %v764_v33 = vadd.f32 %v850_v31, %v815_v30 }
 0x270   :  { %v852_v34 = vpop.f32.mrb[5].mxu1 }
 0x271   :  { %v853_v35 = vadd.f32 %v852_v34, %v851_v32  ;;  %v775_v36 = vsel %vm774_vm0, %v764_v33, -1e+30 }
 0x272   :  { %777 = vmax.xlane.f32.xlu0 %v775_v36 }
 0x273   :  { %v769_v37 = vadd.f32 %v853_v35, %v815_v30 }
 0x275   :  { %v776_v38 = vsel %vm774_vm0, %v769_v37, -1e+30 }
 0x276   :  { %779 = vmax.xlane.f32.xlu0 %v776_v38 }
 0x2ff   :  { %v778_v39 = vpop.xlane.xlu0 %777 }
 0x300   :  { %v781_v40 = vsub.f32 %v775_v36, %v778_v39 }
 0x302   :  { %v783_v41 = vmul.f32 1.442695, %v781_v40 }
 0x303   :  { %v780_v42 = vpop.xlane.xlu0 %779 }
 0x304   :  { %1184 = vpow2.f32 %v783_v41  ;;  %v782_v43 = vsub.f32 %v776_v38, %v780_v42 }
 0x306   :  { %v785_v44 = vmul.f32 1.442695, %v782_v43 }
 0x308   :  { %1186 = vpow2.f32 %v785_v44 }
 0x30e   :  { %v1185_v45 = vpop.eup %1184 }
 0x30f   :  { %787 = vadd.xlane.f32.xlu1 %v1185_v45 }
 0x312   :  { %v1187_v46 = vpop.eup %1186 }
 0x313   :  { %789 = vadd.xlane.f32.xlu1 %v1187_v46 }
 0x39c   :  { %v788_v47 = vpop.xlane.xlu1 %787 }
 0x39d   :  { %1188 = vrcp.f32 %v788_v47 }
 0x3a0   :  { %v790_v48 = vpop.xlane.xlu1 %789 }
 0x3a1   :  { %1190 = vrcp.f32 %v790_v48 }
 0x3a7   :  { %v1189_v49 = vpop.eup %1188 }
 0x3a8   :  { %v793_v50 = vmul.f32 %v1189_v49, %v1185_v45 }
 0x3aa   :  { %795 = vst [vmem:[#allocation8] sm:$0xff] %v793_v50 }
 0x3ab   :  { %v1191_v51 = vpop.eup %1190 }
 0x3ac   :  { %v794_v52 = vmul.f32 %v1191_v51, %v1187_v46 }
 0x3ae   :  { %796 = vst [vmem:[#allocation8 + $0x8] sm:$0xff] %v794_v52 }
 0x3af   :  { %1269 = shalt.err (!%p1266_p0)
}
 0x3b0   :  { %s1270_s14 = scalar_lea.hbm %s1391_s5, 256 }
 0x3b1   :  { %p1271_p1 = scmp.ne.s32.totalorder %s1391_s5, %s1270_s14  ;;  %p1274_p2 = scmp.lt.u32.totalorder %s1270_s14, %s1391_s5 }
 0x3b3   :  { %p1276_p3 = pnand %p1274_p2, %p1271_p1 }
 0x3b5   :  { %1279 = shalt.err (!%p1276_p3)
}
 0x3b6   :  { %808 = dma.vmem_to_hbm [thread:$0]  %s803_s10, 256, %s1391_s5, [#allocation4], %s1293_s0, %s1293_s0, %s1294_s30  }
 0x3b7   :  { %1284 = dma.done.wait [#allocation4], 256  }
 0x3b8   :  { %1285 = vsyncadd [#allocation4], 4294967040 }
 0x3b9   :  { %812 = vsyncpa [#allocation3], 1 }
 0x3ba   :  { %813 = vsyncpa [#allocation6], 1 }
 0x3bb   :  { %814 = vsyncpa [#allocation4], 1 }

</bundles_post_ra>
